<compile_context>
chip_gen: v6e
topology: v6e:2x2x1
jax: 0.10.0
libtpu: 0.0.40
codegen_flags: <defaults>
</compile_context>

<pallas_src>
import functools

import jax
import jax.numpy as jnp
from jax.experimental import pallas as pl
from jax.experimental.pallas import tpu as pltpu


_NUM_SPLITS = 2                          # outer 'parallel' axis (megacore on v7x)
_TN_MAX = 16384                          # max batch lanes per tile
_VMEM_INPUT_BUDGET = 12 * 1024 * 1024    # bytes: 4 inputs x 2 pipeline buffers
_LANE = 128
_SUBLANE = 8


def _round_up(x, m):
    return ((x + m - 1) // m) * m


def _fdal_loss_kernel(ys_ref, yt_ref, ysa_ref, yta_ref, out_ref,
                      *, gamma, multiplier, inv_n, use_nll, num_classes):
    """Processes one (K, TN) tile: classes on sublanes, batch on lanes."""
    i = pl.program_id(1)                 # inner ('arbitrary') reduction axis

    ys = ys_ref[...].astype(jnp.float32)     # (K, TN)
    yt = yt_ref[...].astype(jnp.float32)
    ysa = ysa_ref[...].astype(jnp.float32)
    yta = yta_ref[...].astype(jnp.float32)

    if use_nll:
        row = jax.lax.broadcasted_iota(jnp.int32, ys.shape, 0)      # (K, TN)

        def gather_at_argmax(logits, adv):
            # argmax over classes (sublane axis) with first-occurrence
            # tie-break (matches torch.max), then gather adv at that index.
            mx = jnp.max(logits, axis=0, keepdims=True)             # (1, TN)
            is_max = logits >= mx                                   # (K, TN)
            first = jnp.min(jnp.where(is_max, row, num_classes),
                            axis=0, keepdims=True)                  # (1, TN)
            onehot = (row == first).astype(jnp.float32)             # (K, TN)
            return jnp.sum(adv * onehot, axis=0, keepdims=True)     # (1, TN)

        v_s = gather_at_argmax(ys, ysa)
        v_t = gather_at_argmax(yt, yta)
    else:
        # K == 1: adversarial outputs used directly (already lane-dense).
        v_s = ysa[0:1, :]
        v_t = yta[0:1, :]

    # pearson divergence: gf(v) = v ; phistar(gf(t)) = 0.25 t^2 + t
    gf_s = v_s
    phistar_t = 0.25 * v_t * v_t + v_t

    # Partial contribution of this tile; zero-padded columns contribute 0.
    part = (-multiplier) * (gamma * jnp.sum(gf_s) - jnp.sum(phistar_t)) * inv_n

    @pl.when(i == 0)
    def _():
        out_ref[...] = jnp.zeros_like(out_ref)

    out_ref[...] += part


def fdal_loss(y_s, y_t, y_s_adv, y_t_adv, K, gamma=2.0, multiplier=1.0):
    """Pallas TPU implementation of fDALLoss.forward (pearson divergence)."""
    def as_2d(x):
        x = jnp.asarray(x)
        return x[:, None] if x.ndim == 1 else x

    y_s, y_t, y_s_adv, y_t_adv = map(as_2d, (y_s, y_t, y_s_adv, y_t_adv))
    n, k = y_s.shape

    # Tile sizing: biggest lane-tile fitting the VMEM budget with
    # double-buffered inputs, without grossly overshooting the split batch.
    k_pad = _round_up(max(k, 1), _SUBLANE)
    tn = _VMEM_INPUT_BUDGET // (4 * 2 * k_pad * 4)
    tn = max(_LANE, min(_TN_MAX, (tn // _LANE) * _LANE))
    tn = min(tn, _round_up(pl.cdiv(n, _NUM_SPLITS), _LANE))
    n_pad = _round_up(n, _NUM_SPLITS * tn)
    blocks_per_split = n_pad // (_NUM_SPLITS * tn)

    def prep(x):
        xt = x.T                                    # (K, N): batch on lanes
        pad = n_pad - xt.shape[1]
        if pad:
            xt = jnp.pad(xt, ((0, 0), (0, pad)))    # zeros contribute 0
        return xt

    inputs = [prep(x) for x in (y_s, y_t, y_s_adv, y_t_adv)]

    kernel = functools.partial(
        _fdal_loss_kernel,
        gamma=float(gamma),
        multiplier=float(multiplier),
        inv_n=1.0 / float(n),        # global batch size (not the tile size)
        use_nll=(K > 1),
        num_classes=k,
    )

    in_spec = pl.BlockSpec((k, tn),
                           lambda c, i: (0, c * blocks_per_split + i))
    out_spec = pl.BlockSpec((1, _SUBLANE, _LANE), lambda c, i: (c, 0, 0))

    partials = pl.pallas_call(
        kernel,
        out_shape=jax.ShapeDtypeStruct((_NUM_SPLITS, _SUBLANE, _LANE),
                                       jnp.float32),
        grid=(_NUM_SPLITS, blocks_per_split),
        in_specs=[in_spec] * 4,
        out_specs=out_spec,
        compiler_params=pltpu.CompilerParams(
            dimension_semantics=("parallel", "arbitrary"),
            vmem_limit_bytes=32 * 1024 * 1024,
        ),
    )(*inputs)

    # Tiny cross-split reduction done wrapper-side (sums the two TC partials).
    return jnp.sum(partials[:, 0, 0])


def _reference_loss(y_s, y_t, y_s_adv, y_t_adv, K, gamma, multiplier):
    # Pure-JAX reference mirroring the PyTorch module.
    if K > 1:
        n = y_s.shape[0]
        rows = jnp.arange(n)
        v_s = y_s_adv[rows, jnp.argmax(y_s, axis=1)]
        v_t = y_t_adv[rows, jnp.argmax(y_t, axis=1)]
    else:
        v_s, v_t = y_s_adv[:, 0], y_t_adv[:, 0]
    dst = gamma * jnp.mean(v_s) - jnp.mean(0.25 * v_t * v_t + v_t)
    return -multiplier * dst


if __name__ == "__main__":
    # Small shapes: batch N=16, classes K=8.
    N, K = 16, 8
    gamma = 2.0
    multiplier = 1.0

    key = jax.random.PRNGKey(0)
    k1, k2, k3, k4 = jax.random.split(key, 4)
    y_s = jax.random.normal(k1, (N, K), dtype=jnp.float32)        # task logits (source)
    y_t = jax.random.normal(k2, (N, K), dtype=jnp.float32)        # task logits (target)
    # adversarial head outputs (log-prob-like values)
    y_s_adv = jax.nn.log_softmax(jax.random.normal(k3, (N, K), dtype=jnp.float32), axis=1)
    y_t_adv = jax.nn.log_softmax(jax.random.normal(k4, (N, K), dtype=jnp.float32), axis=1)

    loss = fdal_loss(y_s, y_t, y_s_adv, y_t_adv, K, gamma=gamma, multiplier=multiplier)
    loss = jax.block_until_ready(loss)

    ref = _reference_loss(y_s, y_t, y_s_adv, y_t_adv, K, gamma, multiplier)
    assert jnp.allclose(loss, ref, rtol=1e-5, atol=1e-5), (loss, ref)

    print("KERNEL_OK")
</pallas_src>

<mosaic_0001>
module attributes {stable_mosaic.version = 11 : i64} {
  func.func @_fdal_loss_kernel(%arg0: i32, %arg1: i32, %arg2: memref<8x128xf32, #tpu.memory_space<vmem>>, %arg3: memref<8x128xf32, #tpu.memory_space<vmem>>, %arg4: memref<8x128xf32, #tpu.memory_space<vmem>>, %arg5: memref<8x128xf32, #tpu.memory_space<vmem>>, %arg6: memref<1x8x128xf32, #tpu.memory_space<vmem>>) attributes {dimension_semantics = [#tpu.dimension_semantics<parallel>, #tpu.dimension_semantics<arbitrary>], iteration_bounds = array<i64: 2, 1>, scalar_prefetch = 0 : i64, scratch_operands = 0 : i64, tpu.core_type = #tpu.core_type<tc>, window_params = [{transform_indices = @transform_0, window_bounds = array<i64: 8, 128>}, {transform_indices = @transform_1, window_bounds = array<i64: 8, 128>}, {transform_indices = @transform_2, window_bounds = array<i64: 8, 128>}, {transform_indices = @transform_3, window_bounds = array<i64: 8, 128>}, {transform_indices = @transform_4, window_bounds = array<i64: 1, 8, 128>}]} {
    %c0 = arith.constant 0 : index
    %c0_0 = arith.constant 0 : index
    %0 = vector.load %arg2[%c0, %c0_0] : memref<8x128xf32, #tpu.memory_space<vmem>>, vector<8x128xf32>
    %c0_1 = arith.constant 0 : index
    %c0_2 = arith.constant 0 : index
    %1 = vector.load %arg3[%c0_1, %c0_2] : memref<8x128xf32, #tpu.memory_space<vmem>>, vector<8x128xf32>
    %c0_3 = arith.constant 0 : index
    %c0_4 = arith.constant 0 : index
    %2 = vector.load %arg4[%c0_3, %c0_4] : memref<8x128xf32, #tpu.memory_space<vmem>>, vector<8x128xf32>
    %c0_5 = arith.constant 0 : index
    %c0_6 = arith.constant 0 : index
    %3 = vector.load %arg5[%c0_5, %c0_6] : memref<8x128xf32, #tpu.memory_space<vmem>>, vector<8x128xf32>
    %4 = tpu.iota {dimensions = array<i32: 0>} : vector<8x128xi32>
    %cst = arith.constant dense<0xFF800000> : vector<128xf32>
    %5 = vector.multi_reduction <maximumf>, %0, %cst [0] : vector<8x128xf32> to vector<128xf32>
    %6 = vector.shape_cast %5 : vector<128xf32> to vector<1x128xf32>
    %7 = vector.broadcast %6 : vector<1x128xf32> to vector<8x128xf32>
    %8 = arith.cmpf oge, %0, %7 : vector<8x128xf32>
    %c8_i32 = arith.constant 8 : i32
    %9 = vector.broadcast %c8_i32 : i32 to vector<8x128xi32>
    %10 = arith.select %8, %4, %9 : vector<8x128xi1>, vector<8x128xi32>
    %cst_7 = arith.constant dense<2147483647> : vector<128xi32>
    %11 = vector.multi_reduction <minsi>, %10, %cst_7 [0] : vector<8x128xi32> to vector<128xi32>
    %12 = vector.shape_cast %11 : vector<128xi32> to vector<1x128xi32>
    %13 = vector.broadcast %12 : vector<1x128xi32> to vector<8x128xi32>
    %14 = arith.cmpi eq, %4, %13 : vector<8x128xi32>
    %15 = arith.extui %14 : vector<8x128xi1> to vector<8x128xi32>
    %16 = arith.sitofp %15 : vector<8x128xi32> to vector<8x128xf32>
    %17 = arith.mulf %2, %16 : vector<8x128xf32>
    %cst_8 = arith.constant dense<0.000000e+00> : vector<128xf32>
    %18 = vector.multi_reduction <add>, %17, %cst_8 [0] : vector<8x128xf32> to vector<128xf32>
    %19 = vector.shape_cast %18 : vector<128xf32> to vector<1x128xf32>
    %cst_9 = arith.constant dense<0xFF800000> : vector<128xf32>
    %20 = vector.multi_reduction <maximumf>, %1, %cst_9 [0] : vector<8x128xf32> to vector<128xf32>
    %21 = vector.shape_cast %20 : vector<128xf32> to vector<1x128xf32>
    %22 = vector.broadcast %21 : vector<1x128xf32> to vector<8x128xf32>
    %23 = arith.cmpf oge, %1, %22 : vector<8x128xf32>
    %c8_i32_10 = arith.constant 8 : i32
    %24 = vector.broadcast %c8_i32_10 : i32 to vector<8x128xi32>
    %25 = arith.select %23, %4, %24 : vector<8x128xi1>, vector<8x128xi32>
    %cst_11 = arith.constant dense<2147483647> : vector<128xi32>
    %26 = vector.multi_reduction <minsi>, %25, %cst_11 [0] : vector<8x128xi32> to vector<128xi32>
    %27 = vector.shape_cast %26 : vector<128xi32> to vector<1x128xi32>
    %28 = vector.broadcast %27 : vector<1x128xi32> to vector<8x128xi32>
    %29 = arith.cmpi eq, %4, %28 : vector<8x128xi32>
    %30 = arith.extui %29 : vector<8x128xi1> to vector<8x128xi32>
    %31 = arith.sitofp %30 : vector<8x128xi32> to vector<8x128xf32>
    %32 = arith.mulf %3, %31 : vector<8x128xf32>
    %cst_12 = arith.constant dense<0.000000e+00> : vector<128xf32>
    %33 = vector.multi_reduction <add>, %32, %cst_12 [0] : vector<8x128xf32> to vector<128xf32>
    %34 = vector.shape_cast %33 : vector<128xf32> to vector<1x128xf32>
    %cst_13 = arith.constant 2.500000e-01 : f32
    %35 = vector.broadcast %cst_13 : f32 to vector<1x128xf32>
    %36 = arith.mulf %35, %34 : vector<1x128xf32>
    %37 = arith.mulf %36, %34 : vector<1x128xf32>
    %38 = arith.addf %37, %34 : vector<1x128xf32>
    %39 = vector.shape_cast %19 : vector<1x128xf32> to vector<1x1x128xf32>
    %cst_14 = arith.constant dense<0.000000e+00> : vector<1xf32>
    %40 = vector.multi_reduction <add>, %39, %cst_14 [1, 2] : vector<1x1x128xf32> to vector<1xf32>
    %41 = vector.shape_cast %40 : vector<1xf32> to vector<1x1x1xf32>
    %42 = vector.extract %41[0, 0, 0] : f32 from vector<1x1x1xf32>
    %cst_15 = arith.constant 2.000000e+00 : f32
    %43 = arith.mulf %cst_15, %42 : f32
    %44 = vector.shape_cast %38 : vector<1x128xf32> to vector<1x1x128xf32>
    %cst_16 = arith.constant dense<0.000000e+00> : vector<1xf32>
    %45 = vector.multi_reduction <add>, %44, %cst_16 [1, 2] : vector<1x1x128xf32> to vector<1xf32>
    %46 = vector.shape_cast %45 : vector<1xf32> to vector<1x1x1xf32>
    %47 = vector.extract %46[0, 0, 0] : f32 from vector<1x1x1xf32>
    %48 = arith.subf %43, %47 : f32
    %cst_17 = arith.constant -1.000000e+00 : f32
    %49 = arith.mulf %cst_17, %48 : f32
    %cst_18 = arith.constant 6.250000e-02 : f32
    %50 = arith.mulf %49, %cst_18 : f32
    %c0_i32 = arith.constant 0 : i32
    %51 = arith.cmpi eq, %arg1, %c0_i32 : i32
    %52 = arith.extui %51 : i1 to i32
    %c0_i32_19 = arith.constant 0 : i32
    %53 = arith.cmpi ne, %52, %c0_i32_19 : i32
    scf.if %53 {
      %cst_26 = arith.constant 0.000000e+00 : f32
      %58 = vector.broadcast %cst_26 : f32 to vector<1x8x128xf32>
      %c0_27 = arith.constant 0 : index
      %c0_28 = arith.constant 0 : index
      %c0_29 = arith.constant 0 : index
      %59 = vector.load %arg6[%c0_27, %c0_28, %c0_29] : memref<1x8x128xf32, #tpu.memory_space<vmem>>, vector<1x8x128xf32>
      tpu.vector_store %arg6[%c0_27, %c0_28, %c0_29], %58 {strides = array<i32>} : memref<1x8x128xf32, #tpu.memory_space<vmem>>, vector<1x8x128xf32>,
    } else {
    }
    %c0_20 = arith.constant 0 : index
    %c0_21 = arith.constant 0 : index
    %c0_22 = arith.constant 0 : index
    %54 = vector.load %arg6[%c0_20, %c0_21, %c0_22] : memref<1x8x128xf32, #tpu.memory_space<vmem>>, vector<1x8x128xf32>
    %55 = vector.broadcast %50 : f32 to vector<1x8x128xf32>
    %56 = arith.addf %54, %55 : vector<1x8x128xf32>
    %c0_23 = arith.constant 0 : index
    %c0_24 = arith.constant 0 : index
    %c0_25 = arith.constant 0 : index
    %57 = vector.load %arg6[%c0_23, %c0_24, %c0_25] : memref<1x8x128xf32, #tpu.memory_space<vmem>>, vector<1x8x128xf32>
    tpu.vector_store %arg6[%c0_23, %c0_24, %c0_25], %56 {strides = array<i32>} : memref<1x8x128xf32, #tpu.memory_space<vmem>>, vector<1x8x128xf32>,
    return
  }
  func.func @transform_0(%arg0: i32, %arg1: i32) -> (i32, i32) {
    %c1_i32 = arith.constant 1 : i32
    %0 = arith.muli %arg0, %c1_i32 : i32
    %1 = arith.addi %0, %arg1 : i32
    %c0_i32 = arith.constant 0 : i32
    %c0_i32_0 = arith.constant 0 : i32
    return %c0_i32, %1 : i32, i32
  }
  func.func @transform_1(%arg0: i32, %arg1: i32) -> (i32, i32) {
    %c1_i32 = arith.constant 1 : i32
    %0 = arith.muli %arg0, %c1_i32 : i32
    %1 = arith.addi %0, %arg1 : i32
    %c0_i32 = arith.constant 0 : i32
    %c0_i32_0 = arith.constant 0 : i32
    return %c0_i32, %1 : i32, i32
  }
  func.func @transform_2(%arg0: i32, %arg1: i32) -> (i32, i32) {
    %c1_i32 = arith.constant 1 : i32
    %0 = arith.muli %arg0, %c1_i32 : i32
    %1 = arith.addi %0, %arg1 : i32
    %c0_i32 = arith.constant 0 : i32
    %c0_i32_0 = arith.constant 0 : i32
    return %c0_i32, %1 : i32, i32
  }
  func.func @transform_3(%arg0: i32, %arg1: i32) -> (i32, i32) {
    %c1_i32 = arith.constant 1 : i32
    %0 = arith.muli %arg0, %c1_i32 : i32
    %1 = arith.addi %0, %arg1 : i32
    %c0_i32 = arith.constant 0 : i32
    %c0_i32_0 = arith.constant 0 : i32
    return %c0_i32, %1 : i32, i32
  }
  func.func @transform_4(%arg0: i32, %arg1: i32) -> (i32, i32, i32) {
    %c0_i32 = arith.constant 0 : i32
    %c0_i32_0 = arith.constant 0 : i32
    %c0_i32_1 = arith.constant 0 : i32
    return %arg0, %c0_i32, %c0_i32_0 : i32, i32, i32
  }
}

</mosaic_0001>

<bundles_post_ra>
// kernel: tpu_custom_call.1
= control target key start
LH: loop header
LB: loop body
LE: loop exit
PB: predicated region body
PF: predicated region fallthrough
CT: control target
= control target key end

     0   :  { %s1166_s0 = inlined_call_operand.hbm [shape: f32[8,256], index: 0, kind: input, shape index: {}]   ;;  %s1167_s1 = inlined_call_operand.hbm [shape: f32[8,256], index: 1, kind: input, shape index: {}]   ;;  %s1168_s2 = inlined_call_operand.hbm [shape: f32[8,256], index: 2, kind: input, shape index: {}]   ;;  %s1169_s3 = inlined_call_operand.hbm [shape: f32[8,256], index: 3, kind: input, shape index: {}]   ;;  %s1170_s4 = inlined_call_operand.hbm [shape: f32[2,8,128], index: 4, kind: output, shape index: {}]  }
   0x1   :  { %1174 = sst [smem:[#allocation19_spill]] %s1167_s1 }
   0x2   :  { %9 = vsyncpa [#allocation3], 0 }
   0x3   :  { %11 = vsyncpa [#allocation3 + $0x1], 0 }
   0x4   :  { %12 = vsyncpa [#allocation6], 0 }
   0x5   :  { %14 = vsyncpa [#allocation6 + $0x1], 0 }
   0x6   :  { %15 = vsyncpa [#allocation9], 0 }
   0x7   :  { %17 = vsyncpa [#allocation9 + $0x1], 0 }
   0x8   :  { %18 = vsyncpa [#allocation4], 0 }
   0x9   :  { %20 = vsyncpa [#allocation4 + $0x1], 0  ;;  %s947_s15 = smov 0   ;;  %s949_s16 = smov 0  }
   0xa   :  { %s951_s17 = smov 0   ;;  %s953_s18 = smov 0  }
   0xb   :  { %s955_s19 = smov 0   ;;  %s957_s20 = smov 0  }
   0xc LB: > { %1175 = sst [smem:[#allocation15_spill]] %s902_s17  ;;  %s978_s21 = sadd.s32 4294967295, %s914_s20   ;;  %s914_s20 = sphi %s957_s20, %s26_s20   ;;  %s910_s19 = sphi %s955_s19, %s1190_s19   ;;  %s906_s18 = sphi %s953_s18, %s1189_s18   ;;  %s902_s17 = sphi %s951_s17, %s1188_s17   ;;  %s898_s16 = sphi %s949_s16, %s1192_s16   ;;  %s894_s15 = sphi %s947_s15, %s1191_s15  }
   0xd   : > { %1176 = sst [smem:[#allocation16_spill]] %s910_s19  ;;  %s609_s22 = sadd.s32 4294967294, %s914_s20  }
   0xe   : > { %s38_s23 = sadd.s32 1, %s910_s19  ;;  %s47_s24 = sadd.s32 1, %s902_s17 }
   0xf   : > { %p40_p0 = scmp.ge.s32.totalorder %s38_s23, 2  ;;  %p54_p1 = scmp.ne.s32.totalorder %s902_s17, %s898_s16 }
  0x10   : > { %p55_p2 = scmp.eq.s32.totalorder %s914_s20, 0  ;;  %p60_p3 = scmp.ne.s32.totalorder %s898_s16, %s894_s15 }
  0x11   : > { %s1194_s23 = smov (%p40_p0, %s38_s23), 0  ;;  %p61_p5 = scmp.eq.s32.totalorder %s978_s21, 0 }
  0x12   : > { %1177 = sst [smem:[#allocation17_spill]] %s1194_s23  ;;  %p990_p4 = por %p55_p2, %p54_p1 }
  0x13   : > { %s44_s26 = ssub.s32 %s910_s19, %s1194_s23  ;;  %p168_p6 = scmp.eq.s32.totalorder %s978_s21, 1 }
  0x14   : > { %p45_p7 = scmp.eq.s32.totalorder %s44_s26, 0  ;;  %p998_p8 = por %p61_p5, %p60_p3 }
  0x15   : > { %p1002_p9 = por %p168_p6, %p54_p1  ;;  %p174_p10 = scmp.eq.s32.totalorder %s609_s22, 1 }
  0x16   : > { %s1007_s29 = scalar_select %p45_p7, %s902_s17, %s47_s24  }
  0x17   : > { %p1009_p11 = por %p174_p10, %p60_p3  ;;  %p663_p13 = scmp.lt.s32.totalorder %s914_s20, 2 }
  0x18   : > { %1181 = sst [smem:[#allocation18_spill]] %s1007_s29  ;;  %s1016_s5 = sand.u32 1, %s902_s17  }
  0x19   : > { %s1019_s6 = sshll.u32 %s1016_s5, 3  ;;  %s1022_s7 = sshll.u32 %s910_s19, 7 }
  0x1a   : > { %p1026_p0 = pnand %p663_p13, %p990_p4  ;;  %s213_s9 = sand.u32 1, %s914_s20  }
  0x1b   : > { %s1184_s1 = sld [smem:[#allocation19_spill]]  ;;  %s217_s13 = scalar_lea.vmem [#allocation5], %s1019_s6 }
  0x1c   : > { %s225_s14 = sshll.u32 %s217_s13, 4  ;;  %p620_p1 = scmp.ge.s32.totalorder %s914_s20, 1  ;;  %s226_s14 = int_to_ptr.vmem [resolvable:$true] %s225_s14 }
  0x1d   : > { %p268_p2 = scmp.lt.s32.totalorder %s914_s20, 3  ;;  %s1038_s22 = scalar_lea.sflag [#allocation6], %s213_s9 }
  0x1e   : > { %p716_p3 = pneg %p1026_p0  ;;  %s727_s24 = scalar_lea.vmem %s226_s14, 128 }
  0x1f   : > { %p728_p4 = scmp.ne.s32.totalorder %s226_s14, %s727_s24  ;;  %s916_s25 = smov [#allocation5]  }
  0x20   : > { %s732_s26 = sshll.u32 %s916_s25, 4  ;;  %s733_s26 = int_to_ptr.vmem [resolvable:$false] %s732_s26 }
  0x21   : > { %s223_s12 = scalar_lea.hbm %s1184_s1, %s1022_s7  ;;  %p730_p5 = pnand %p728_p4, %p716_p3 }
  0x22   : > { %s734_s10 = scalar_lea.vmem %s733_s26, 256  ;;  %p735_p7 = scmp.lt.s32.totalorder %s226_s14, %s733_s26 }
  0x23   : > { %p731_p6 = pneg %p730_p5  ;;  %p736_p10 = scmp.lt.s32.totalorder %s734_s10, %s727_s24 }
  0x25   : > { %p737_p13 = por %p736_p10, %p735_p7 }
  0x27   : > { %p738_p12 = pnand %p737_p13, %p731_p6 }
  0x29   : > { %741 = shalt.err (!%p738_p12)
}
  0x2a   : > { %652 = dma.hbm_to_vmem [thread:$0]  (!%p1026_p0), %s223_s12, 128, %s226_s14, %s1038_s22  }
  0x2b   : > { %p1052_p4 = pnand %p620_p1, %p268_p2  ;;  %s204_s24 = scalar_lea.hbm %s1166_s0, %s1022_s7 }
  0x2c   : > { %s198_s25 = scalar_lea.vmem [#allocation2], %s1019_s6  ;;  %s242_s23 = scalar_lea.hbm %s1168_s2, %s1022_s7 }
  0x2d   : > { %s206_s26 = sshll.u32 %s198_s25, 4  ;;  %s195_s19 = scalar_lea.sflag [#allocation3], %s1016_s5  ;;  %s207_s26 = int_to_ptr.vmem [resolvable:$true] %s206_s26 }
  0x2e   : > { %s755_s29 = scalar_lea.vmem %s207_s26, 128  ;;  %s917_s12 = smov [#allocation2]  }
  0x2f   : > { %p756_p12 = scmp.ne.s32.totalorder %s207_s26, %s755_s29  ;;  %s760_s14 = sshll.u32 %s917_s12, 4  ;;  %s761_s14 = int_to_ptr.vmem [resolvable:$false] %s760_s14 }
  0x30   : > { %s762_s17 = scalar_lea.vmem %s761_s14, 256  ;;  %p763_p5 = scmp.lt.s32.totalorder %s207_s26, %s761_s14 }
  0x31   : > { %p758_p1 = pnand %p756_p12, %p716_p3  ;;  %p764_p6 = scmp.lt.s32.totalorder %s762_s17, %s755_s29 }
  0x33   : > { %p759_p2 = pneg %p758_p1  ;;  %p765_p7 = por %p764_p6, %p763_p5 }
  0x35   : > { %p766_p10 = pnand %p765_p7, %p759_p2 }
  0x37   : > { %769 = shalt.err (!%p766_p10)
}
  0x38   : > { %649 = dma.hbm_to_vmem [thread:$0]  (!%p1026_p0), %s204_s24, 128, %s207_s26, %s195_s19  }
  0x39   : > { %s236_s1 = scalar_lea.vmem [#allocation7], %s1019_s6  ;;  %s918_s25 = smov [#allocation7]  }
  0x3a   : > { %s244_s11 = sshll.u32 %s236_s1, 4  ;;  %s788_s10 = sshll.u32 %s918_s25, 4  ;;  %s245_s11 = int_to_ptr.vmem [resolvable:$true] %s244_s11  ;;  %s789_s10 = int_to_ptr.vmem [resolvable:$false] %s788_s10 }
  0x3b   : > { %s783_s13 = scalar_lea.vmem %s245_s11, 128  ;;  %s790_s17 = scalar_lea.vmem %s789_s10, 256 }
  0x3c   : > { %p784_p13 = scmp.ne.s32.totalorder %s245_s11, %s783_s13  ;;  %p791_p2 = scmp.lt.s32.totalorder %s245_s11, %s789_s10 }
  0x3d   : > { %p792_p5 = scmp.lt.s32.totalorder %s790_s17, %s783_s13 }
  0x3e   : > { %p786_p12 = pnand %p784_p13, %p716_p3 }
  0x3f   : > { %p793_p6 = por %p792_p5, %p791_p2 }
  0x40   : > { %p787_p1 = pneg %p786_p12 }
  0x42   : > { %p794_p7 = pnand %p793_p6, %p787_p1 }
  0x44   : > { %797 = shalt.err (!%p794_p7)
}
  0x45   : > { %655 = dma.hbm_to_vmem [thread:$0]  (!%p1026_p0), %s242_s23, 128, %s245_s11, %s1038_s22  }
  0x46   : > { %s261_s12 = scalar_lea.hbm %s1169_s3, %s1022_s7  ;;  %s255_s14 = scalar_lea.vmem [#allocation8], %s1019_s6 }
  0x47   : > { %s263_s1 = sshll.u32 %s255_s14, 4  ;;  %s252_s13 = scalar_lea.sflag [#allocation9], %s1016_s5  ;;  %s264_s1 = int_to_ptr.vmem [resolvable:$true] %s263_s1 }
  0x48   : > { %s811_s25 = scalar_lea.vmem %s264_s1, 128  ;;  %s919_s10 = smov [#allocation8]  }
  0x49   : > { %p812_p10 = scmp.ne.s32.totalorder %s264_s1, %s811_s25  ;;  %s816_s17 = sshll.u32 %s919_s10, 4  ;;  %s817_s17 = int_to_ptr.vmem [resolvable:$false] %s816_s17 }
  0x4a   : > { %s818_s19 = scalar_lea.vmem %s817_s17, 256  ;;  %p819_p1 = scmp.lt.s32.totalorder %s264_s1, %s817_s17 }
  0x4b   : > { %p814_p13 = pnand %p812_p10, %p716_p3  ;;  %p820_p2 = scmp.lt.s32.totalorder %s818_s19, %s811_s25 }
  0x4d   : > { %p815_p12 = pneg %p814_p13  ;;  %p821_p5 = por %p820_p2, %p819_p1 }
  0x4f   : > { %p822_p6 = pnand %p821_p5, %p815_p12 }
  0x51   : > { %825 = shalt.err (!%p822_p6)
}
  0x52   : > { %658 = dma.hbm_to_vmem [thread:$0]  (!%p1026_p0), %s261_s12, 128, %s264_s1, %s252_s13  }
  0x53   : > { %272 = sbr.rel (%p1052_p4) target bundleno = 365 (0x16d), region = 36  ;;  %s1097_s23 = sand.u32 (!%p1052_p4), 1, %s898_s16  }
  0x54   : > { %s1100_s5 = sshll.u32 (!%p1052_p4), %s1097_s23, 3  ;;  %s275_s6 = scalar_lea.sflag (!%p1052_p4), [#allocation3], %s1097_s23 }
  0x55   : > { %s278_s7 = scalar_lea.vmem (!%p1052_p4), [#allocation2], %s1100_s5 }
  0x58   : > { %877 = dma.done.wait (%p998_p8), %s275_s6, 128  }
  0x59   : > { %879 = vsyncadd (%p998_p8), %s275_s6, 4294967168  ;;  %s283_s8 = sand.u32 1, %s978_s21   ;;  %s287_s9 = scalar_lea.vmem [#allocation5], %s1100_s5 }
  0x5a   : > { %s284_s22 = scalar_lea.sflag [#allocation6], %s283_s8 }
  0x5b   : > { %881 = dma.done.wait (%p998_p8), %s284_s22, 256  }
  0x5c   : > { %883 = vsyncadd (%p998_p8), %s284_s22, 4294967040  ;;  %s296_s11 = scalar_lea.vmem [#allocation7], %s1100_s5  ;;  %s302_s29 = scalar_lea.sflag [#allocation9], %s1097_s23 }
  0x5d   : > { %s305_s24 = scalar_lea.vmem [#allocation8], %s1100_s5 }
  0x5e   : > { %885 = dma.done.wait (%p998_p8), %s302_s29, 128  }
  0x5f   : > { %887 = vsyncadd (%p998_p8), %s302_s29, 4294967168  ;;  %v349_v0 = vld [vmem:[%s278_s7] sm:$0xff]  ;;  %v350_v1 = vld [vmem:[%s287_s9] sm:$0xff]  ;;  %v353_v8 = vlaneseq  ;;  %v920_v32 = vmov 0.0   ;;  %vm412_vm10 = vcmask 1040384   ;;  %s629_s1 = sshll.u32 %s906_s18, 7 }
  0x60   : > { %v355_v2 = vrot.slane %v349_v0, 4  ;;  %v382_v3 = vrot.slane %v350_v1, 4  ;;  %v351_v28 = vld [vmem:[%s296_s11] sm:$0xff]  ;;  %v352_v31 = vld [vmem:[%s305_s24] sm:$0xff]  ;;  %s344_s25 = scalar_lea.vmem [#allocation10], %s1100_s5  ;;  %s458_s6 = scalar_lea.hbm %s1170_s4, %s629_s1 }
  0x61   : > { %v354_v13 = vshrl.u32 %v353_v8, 7  ;;  %s460_s10 = sshll.u32 %s344_s25, 4  ;;  %s447_s7 = scalar_lea.sflag [#allocation4], %s1097_s23  ;;  %s461_s10 = int_to_ptr.vmem [resolvable:$true] %s460_s10 }
  0x62   : > { %v356_v4 = vmax.f32 %v349_v0, %v355_v2  ;;  %v383_v5 = vmax.f32 %v350_v1, %v382_v3  ;;  %s826_s8 = scalar_lea.vmem %s461_s10, 128  ;;  %s921_s22 = smov [#allocation10]  }
  0x63   : > { %p827_p8 = scmp.ne.s32.totalorder %s461_s10, %s826_s8  ;;  %s830_s9 = sshll.u32 %s921_s22, 4  ;;  %s831_s9 = int_to_ptr.vmem [resolvable:$false] %s830_s9 }
  0x64   : > { %v357_v6 = vrot.slane %v356_v4, 2  ;;  %v384_v7 = vrot.slane %v383_v5, 2  ;;  %s832_s18 = scalar_lea.vmem %s831_s9, 256  ;;  %p833_p4 = scmp.lt.s32.totalorder %s461_s10, %s831_s9 }
  0x65   : > { %p828_p0 = pnand %p827_p8, %p1002_p9  ;;  %p834_p7 = scmp.lt.s32.totalorder %s832_s18, %s826_s8 }
  0x66   : > { %v358_v9 = vmax.f32 %v356_v4, %v357_v6  ;;  %v385_v10 = vmax.f32 %v383_v5, %v384_v7 }
  0x67   : > { %p829_p3 = pneg %p828_p0  ;;  %p835_p10 = por %p834_p7, %p833_p4 }
  0x68   : > { %v359_v11 = vrot.slane %v358_v9, 1  ;;  %v386_v12 = vrot.slane %v385_v10, 1 }
  0x69   : > { %p836_p13 = pnand %p835_p10, %p829_p3 }
  0x6a   : > { %v360_v14 = vmax.f32 %v358_v9, %v359_v11  ;;  %v387_v15 = vmax.f32 %v385_v10, %v386_v12 }
  0x6c   : > { %vm361_vm0 = vcmp.ge.f32.partialorder %v349_v0, %v360_v14  ;;  %vm388_vm1 = vcmp.ge.f32.partialorder %v350_v1, %v387_v15 }
  0x6d   : > { %v362_v16 = vsel %vm361_vm0, %v354_v13, 8  ;;  %v389_v17 = vsel %vm388_vm1, %v354_v13, 8 }
  0x6e   : > { %v363_v18 = vrot.slane %v362_v16, 4  ;;  %v390_v19 = vrot.slane %v389_v17, 4 }
  0x70   : > { %vm364_vm2 = vcmp.lt.s32.totalorder %v362_v16, %v363_v18  ;;  %vm391_vm3 = vcmp.lt.s32.totalorder %v389_v17, %v390_v19 }
  0x71   : > { %v365_v20 = vsel %vm364_vm2, %v362_v16, %v363_v18  ;;  %v392_v21 = vsel %vm391_vm3, %v389_v17, %v390_v19 }
  0x72   : > { %v366_v22 = vrot.slane %v365_v20, 2  ;;  %v393_v23 = vrot.slane %v392_v21, 2 }
  0x74   : > { %vm367_vm4 = vcmp.lt.s32.totalorder %v365_v20, %v366_v22  ;;  %vm394_vm5 = vcmp.lt.s32.totalorder %v392_v21, %v393_v23 }
  0x75   : > { %v368_v24 = vsel %vm367_vm4, %v365_v20, %v366_v22  ;;  %v395_v25 = vsel %vm394_vm5, %v392_v21, %v393_v23 }
  0x76   : > { %v369_v26 = vrot.slane %v368_v24, 1  ;;  %v396_v27 = vrot.slane %v395_v25, 1 }
  0x78   : > { %vm370_vm6 = vcmp.lt.s32.totalorder %v368_v24, %v369_v26  ;;  %vm397_vm7 = vcmp.lt.s32.totalorder %v395_v25, %v396_v27 }
  0x79   : > { %v371_v29 = vsel %vm370_vm6, %v368_v24, %v369_v26  ;;  %v398_v30 = vsel %vm397_vm7, %v395_v25, %v396_v27 }
  0x7a   : > { %vm372_vm8 = vcmp.eq.s32.totalorder %v354_v13, %v371_v29  ;;  %vm399_vm9 = vcmp.eq.s32.totalorder %v354_v13, %v398_v30 }
  0x7b   : > { %v626_v33 = vsel %vm372_vm8, 1.0, %v920_v32  ;;  %v627_v34 = vsel %vm399_vm9, 1.0, %v920_v32 }
  0x7c   : > { %v375_v35 = vmul.f32 %v626_v33, %v351_v28  ;;  %v402_v36 = vmul.f32 %v627_v34, %v352_v31 }
  0x7e   : > { %v376_v37 = vrot.slane %v375_v35, 4  ;;  %v403_v38 = vrot.slane %v402_v36, 4 }
  0x80   : > { %v377_v39 = vadd.f32 %v376_v37, %v375_v35  ;;  %v404_v40 = vadd.f32 %v403_v38, %v402_v36 }
  0x82   : > { %v378_v41 = vrot.slane %v377_v39, 2  ;;  %v405_v42 = vrot.slane %v404_v40, 2 }
  0x84   : > { %v379_v43 = vadd.f32 %v378_v41, %v377_v39  ;;  %v406_v44 = vadd.f32 %v405_v42, %v404_v40 }
  0x86   : > { %v380_v45 = vrot.slane %v379_v43, 1  ;;  %v407_v46 = vrot.slane %v406_v44, 1 }
  0x88   : > { %v381_v47 = vadd.f32 %v380_v45, %v379_v43  ;;  %v408_v48 = vadd.f32 %v407_v46, %v406_v44 }
  0x8a   : > { %v413_v49 = vsel %vm412_vm10, %v381_v47, 0.0  ;;  %v409_v50 = vmul.f32 0.25, %v408_v48 }
  0x8b   : > { %414 = vadd.xlane.f32.xlu0 %v413_v49 }
  0x8c   : > { %v410_v51 = vmul.f32 %v409_v50, %v408_v48 }
  0x8e   : > { %v411_v52 = vadd.f32 %v410_v51, %v408_v48 }
  0x90   : > { %v424_v53 = vsel %vm412_vm10, %v411_v52, 0.0 }
  0x91   : > { %425 = vadd.xlane.f32.xlu0 %v424_v53 }
 0x114   : > { %v415_v54 = vpop.xlane.xlu0 %414 }
 0x115   : > { %v416_v55 = vrot.slane %v415_v54, 4 }
 0x117   : > { %v417_v56 = vadd.f32 %v416_v55, %v415_v54 }
 0x119   : > { %v418_v57 = vrot.slane %v417_v56, 2 }
 0x11a   : > { %v426_v58 = vpop.xlane.xlu0 %425 }
 0x11b   : > { %v427_v59 = vrot.slane %v426_v58, 4  ;;  %v419_v60 = vadd.f32 %v418_v57, %v417_v56 }
 0x11d   : > { %v428_v61 = vadd.f32 %v427_v59, %v426_v58  ;;  %v420_v62 = vrot.slane %v419_v60, 1 }
 0x11f   : > { %v429_v63 = vrot.slane %v428_v61, 2  ;;  %v421_v0 = vadd.f32 %v420_v62, %v419_v60 }
 0x121   : > { %v430_v1 = vadd.f32 %v429_v63, %v428_v61  ;;  %632 = vpush %v421_v0 }
 0x123   : > { %v431_v2 = vrot.slane %v430_v1, 1 }
 0x125   : > { %v432_v3 = vadd.f32 %v431_v2, %v430_v1 }
 0x127   : > { %634 = vpush %v432_v3 }
 0x152   : > { %s633_s21 = spop %632 }
 0x153   : > { %s423_s27 = smul.f32 2.0, %s633_s21 }
 0x158   : > { %s635_s26 = spop %634 }
 0x159   : > { %s434_s12 = ssub.f32 %s423_s27, %s635_s26 }
 0x15b   : > { %s435_s14 = smul.f32 -1.0, %s434_s12 }
 0x15d   : > { %s436_s13 = smul.f32 0.0625, %s435_s14 }
 0x15f   : > { %v443_v4 = vstv %s436_s13 }
 0x160   : > { %445 = vst [vmem:[%s344_s25] sm:$0xff] %v443_v4 }
 0x161   : > { %839 = shalt.err (!%p836_p13)
}
 0x162   : > { %s840_s5 = scalar_lea.hbm %s458_s6, 128  ;;  %s844_s29 = scalar_lea.hbm %s1170_s4, 256 }
 0x163   : > { %p841_p12 = scmp.ne.s32.totalorder %s458_s6, %s840_s5  ;;  %p845_p5 = scmp.lt.s32.totalorder %s458_s6, %s1170_s4 }
 0x164   : > { %p846_p6 = scmp.lt.s32.totalorder %s844_s29, %s840_s5 }
 0x165   : > { %p842_p1 = pnand %p841_p12, %p1002_p9 }
 0x166   : > { %p847_p8 = por %p846_p6, %p845_p5 }
 0x167   : > { %p843_p2 = pneg %p842_p1 }
 0x169   : > { %p848_p0 = pnand %p847_p8, %p843_p2 }
 0x16b   : > { %851 = shalt.err (!%p848_p0)
}
 0x16c   : > { %644 = dma.vmem_to_hbm [thread:$0]  (%p1002_p9), %s461_s10, 128, %s458_s6, %s447_s7  }
 0x16d PF: > { %s472_s27 = sand.u32 1, %s894_s15   ;;  %p1186_p3 = scmp.ge.s32.totalorder %s914_s20, 2 }
 0x16e   : > { %s473_s26 = scalar_lea.sflag [#allocation4], %s472_s27 }
 0x16f   : > { %p660_p4 = pnand %p1186_p3, %p1009_p11 }
 0x171   : > { %p661_p7 = pneg %p660_p4 }
 0x173   : > { %889 = dma.done.wait (%p661_p7), %s473_s26, 128  }
 0x174   : > { %891 = vsyncadd (%p661_p7), %s473_s26, 4294967168  ;;  %s26_s20 = sadd.s32 1, %s914_s20   ;;  %s1187_s12 = sld [smem:[#allocation15_spill]] }
 0x175   : > { %p23_p10 = scmp.ge.s32.totalorder %s26_s20, 4   ;;  %s1188_s17 = sld [smem:[#allocation18_spill]] }
 0x176   : > { %s1189_s18 = sld [smem:[#allocation16_spill]]  ;;  %s1191_s15 = smov %s898_s16 }
 0x177   : > { %s1190_s19 = sld [smem:[#allocation17_spill]]  ;;  %25 = sbr.rel (!%p23_p10) target bundleno = 12 (0xc), region = 122 }
 0x17a   : > { %s1192_s16 = smov %s1187_s12 }
 0x17c   :  { %478 = vsyncpa [#allocation3], 1 }
 0x17d   :  { %480 = vsyncpa [#allocation3 + $0x1], 1 }
 0x17e   :  { %481 = vsyncpa [#allocation6], 1 }
 0x17f   :  { %483 = vsyncpa [#allocation6 + $0x1], 1 }
 0x180   :  { %484 = vsyncpa [#allocation9], 1 }
 0x181   :  { %486 = vsyncpa [#allocation9 + $0x1], 1 }
 0x182   :  { %487 = vsyncpa [#allocation4], 1 }
 0x183   :  { %489 = vsyncpa [#allocation4 + $0x1], 1 }

</bundles_post_ra>
